<compile_context>
chip_gen: v7x
topology: tpu7x:2x2x1
jax: 0.10.0
libtpu: 0.0.40
codegen_flags: <defaults>
</compile_context>

<pallas_src>
import jax
import jax.numpy as jnp
from jax.experimental import pallas as pl
from jax.experimental.pallas import tpu as pltpu

_LANES = 128


def _cos_kernel(x_ref, o_ref):
    # Elementwise cosine on one VMEM tile.  jnp.cos lowers to a VALU
    # range-reduction + polynomial; streaming f32 stays mem-bound on v5e/v6e.
    # NOTE: if v7x bundle dumps show the VALU slot saturating, the right knob
    # is the 2-TC split below (already applied) / deeper input buffering, not
    # bigger DMAs.
    o_ref[...] = jnp.cos(x_ref[...])


def _chip_params():
    """Best-effort chip detection; conservative defaults if unknown."""
    try:
        kind = jax.devices()[0].device_kind.lower()
    except Exception:  # detection must never break the op
        kind = ""
    is_v7 = ("v7" in kind) or ("tpu7" in kind)
    is_v6 = "v6" in kind
    # ~4 MiB blocks on v6e/v7x: in+out double-buffered => ~16 MiB, under the
    # 32 MiB scoped-VMEM default.  2 MiB on v5e (16 MiB scoped default).
    target_block_bytes = (4 << 20) if (is_v6 or is_v7) else (2 << 20)
    num_tc = 2 if is_v7 else 1  # v7x has 2 TensorCores per chip
    return target_block_bytes, num_tc


def _sublane_quantum(itemsize):
    # Native sublane packing: 8 rows (32-bit), 16 (16-bit), 32 (8-bit).
    return {4: 8, 2: 16, 1: 32}.get(itemsize, 8)


def _choose_row_block(rows, w, itemsize, sublanes, target_bytes, num_tc):
    # Largest sublane-aligned row block with block bytes ~ target_bytes.
    rb = (target_bytes // (w * itemsize)) // sublanes * sublanes
    rb = max(sublanes, rb)
    rb = min(rb, rows)
    if num_tc >= 2:
        # v7x: give both TensorCores pipelined work -- aim for an even step
        # count of at least 4 (>=2 blocks per core) when the array allows it.
        steps = pl.cdiv(rows, rb)
        desired = 2 * num_tc
        if steps < desired and rows >= desired * sublanes:
            rb = pl.cdiv(pl.cdiv(rows, desired), sublanes) * sublanes
            steps = pl.cdiv(rows, rb)
        if steps > 1 and steps % 2 == 1:
            rb_even = pl.cdiv(pl.cdiv(rows, steps + 1), sublanes) * sublanes
            if rb_even >= sublanes and pl.cdiv(rows, rb_even) % 2 == 0:
                rb = rb_even
    return max(1, min(rb, rows))


@jax.jit
def cos_pallas(x: jax.Array) -> jax.Array:
    """cos(x) elementwise via a Pallas TPU kernel (floating dtypes; ints promote to f32)."""
    orig_shape = x.shape
    if not jnp.issubdtype(x.dtype, jnp.floating):
        x = x.astype(jnp.float32)  # torch.cos rejects ints; promote explicitly
    dtype = x.dtype
    itemsize = jnp.dtype(dtype).itemsize
    sublanes = _sublane_quantum(itemsize)
    target_bytes, num_tc = _chip_params()

    n = x.size
    if n == 0:
        return jnp.cos(x)

    needs_pad = False
    last = orig_shape[-1] if len(orig_shape) >= 1 else n
    if (
        len(orig_shape) >= 2
        and last % _LANES == 0
        and sublanes * last * itemsize <= target_bytes
    ):
        # Natural trailing dim is lane-aligned: collapsing leading dims is a
        # free, layout-preserving reshape (no relayout copy).
        W = last
        rows = n // W
        x2d = x.reshape(rows, W)
    else:
        # Fall back to a flat lane-dense slab.  For tile-padded layouts with
        # small trailing dims this ravel may cost one relayout pass, but it is
        # still a net win vs. running the kernel at <128 active lanes.
        x_flat = jnp.ravel(x)
        if n % _LANES == 0:
            padded_n = n
        else:
            # Ragged tail (<128 pad elements).
            # TODO(synk): handle the tail with in-kernel write masking instead
            # of pad+slice to avoid extra HBM passes for ragged sizes.
            padded_n = pl.cdiv(n, _LANES) * _LANES
            needs_pad = True
            x_flat = jnp.pad(x_flat, (0, padded_n - n))
        W = _LANES
        while W * 2 <= 4096 and padded_n % (W * 2) == 0:
            W *= 2
        rows = padded_n // W
        x2d = x_flat.reshape(rows, W)

    row_block = _choose_row_block(rows, W, itemsize, sublanes, target_bytes, num_tc)
    grid = (pl.cdiv(rows, row_block),)

    out2d = pl.pallas_call(
        _cos_kernel,
        out_shape=jax.ShapeDtypeStruct((rows, W), dtype),
        grid=grid,
        in_specs=[pl.BlockSpec((row_block, W), lambda i: (i, 0))],
        out_specs=pl.BlockSpec((row_block, W), lambda i: (i, 0)),
        compiler_params=pltpu.CompilerParams(
            dimension_semantics=("parallel",),
        ),
    )(x2d)

    out = out2d.reshape(-1)
    if needs_pad:
        out = out[:n]
    return out.reshape(orig_shape)


if __name__ == "__main__":
    key = jax.random.PRNGKey(0)
    # Small NCHW-style shape consistent with the module's forward.
    x = jax.random.normal(key, (2, 4, 16, 16), dtype=jnp.float32)

    y = cos_pallas(x)
    jax.block_until_ready(y)

    # correctness check vs reference
    y_ref = jnp.cos(x)
    assert y.shape == x.shape and y.dtype == x.dtype
    assert jnp.allclose(y, y_ref, atol=1e-6, rtol=1e-6)

    print("KERNEL_OK")
</pallas_src>

<mosaic_0001>
module attributes {stable_mosaic.version = 11 : i64} {
  func.func @_cos_kernel(%arg0: i32, %arg1: memref<1x2048xf32, #tpu.memory_space<vmem>>, %arg2: memref<1x2048xf32, #tpu.memory_space<vmem>>) attributes {dimension_semantics = [#tpu.dimension_semantics<parallel>], iteration_bounds = array<i64: 1>, scalar_prefetch = 0 : i64, scratch_operands = 0 : i64, tpu.core_type = #tpu.core_type<tc>, window_params = [{transform_indices = @transform_0, window_bounds = array<i64: 1, 2048>}, {transform_indices = @transform_1, window_bounds = array<i64: 1, 2048>}]} {
    %c0 = arith.constant 0 : index
    %c0_0 = arith.constant 0 : index
    %0 = vector.load %arg1[%c0, %c0_0] : memref<1x2048xf32, #tpu.memory_space<vmem>>, vector<1x2048xf32>
    %1 = math.cos %0 : vector<1x2048xf32>
    %c0_1 = arith.constant 0 : index
    %c0_2 = arith.constant 0 : index
    %2 = vector.load %arg2[%c0_1, %c0_2] : memref<1x2048xf32, #tpu.memory_space<vmem>>, vector<1x2048xf32>
    tpu.vector_store %arg2[%c0_1, %c0_2], %1 {strides = array<i32>} : memref<1x2048xf32, #tpu.memory_space<vmem>>, vector<1x2048xf32>,
    return
  }
  func.func @transform_0(%arg0: i32) -> (i32, i32) {
    %c0_i32 = arith.constant 0 : i32
    %c0_i32_0 = arith.constant 0 : i32
    return %arg0, %c0_i32 : i32, i32
  }
  func.func @transform_1(%arg0: i32) -> (i32, i32) {
    %c0_i32 = arith.constant 0 : i32
    %c0_i32_0 = arith.constant 0 : i32
    return %arg0, %c0_i32 : i32, i32
  }
}

</mosaic_0001>

<bundles_post_ra>
// kernel: cos_pallas.1
= control target key start
LH: loop header
LB: loop body
LE: loop exit
PB: predicated region body
PF: predicated region fallthrough
CT: control target
= control target key end

     0   :  { %v252_v24 = vmov 683565275   ;;  %v253_v26 = vmov 2475754826   ;;  %v254_v28 = vmov 2131351028   ;;  %s366_s0 = inlined_call_operand.vmem [shape: f32[1,2048], index: 0, kind: input, shape index: {}]   ;;  %s367_s1 = inlined_call_operand.vmem [shape: f32[1,2048], index: 1, kind: output, shape index: {}]  }
   0x1   :  { %v271_v0 = vld [vmem:[%s366_s0] sm:$0xff]  ;;  %v276_v1 = vld [vmem:[%s366_s0 + $0x8] sm:$0xff]  ;;  %v255_v30 = vmov 2102212464   ;;  %v256_v32 = vmov 920167782  }
   0x2   :  { %v10_v2 = vand.u32 2147483647, %v271_v0  ;;  %v13_v3 = vand.u32 2139095040, %v271_v0  ;;  %v113_v4 = vand.u32 2147483647, %v276_v1  ;;  %v116_v5 = vand.u32 2139095040, %v276_v1 }
   0x3   :  { %v257_v40 = vmov 1326507024   ;;  %vm12_vm14 = vcmp.lt.s32.totalorder %v271_v0, 0 }
   0x4   :  { %v14_v6 = vshrl.u32 %v13_v3, 23  ;;  %v17_v7 = vand.u32 8388607, %v10_v2  ;;  %v117_v8 = vshrl.u32 %v116_v5, 23  ;;  %v120_v9 = vand.u32 8388607, %v113_v4 }
   0x5   :  { %vm337_vm15 = vcmp.le.f32.partialorder %v10_v2, 0.7853982 }
   0x6   :  { %v222_v10 = vadd.s32 4294967169, %v14_v6  ;;  %v226_v11 = vadd.s32 4294967169, %v117_v8  ;;  %v18_v13 = vor.u32 8388608, %v17_v7  ;;  %v121_v14 = vor.u32 8388608, %v120_v9 }
   0x8   :  { %v20_v12 = vadd.s32 1, %v222_v10  ;;  %v123_v15 = vadd.s32 1, %v226_v11  ;;  %v286_v20 = vshll.u32 %v18_v13, 8  ;;  %v288_v22 = vshll.u32 %v121_v14, 8 }
   0xa   :  { %vm21_vm0 = vcmp.gt.s32.totalorder %v20_v12, 0  ;;  %vm124_vm1 = vcmp.gt.s32.totalorder %v123_v15, 0 }
   0xb   :  { %v22_v16 = vsel %vm21_vm0, %v20_v12, 0  ;;  %v125_v19 = vsel %vm124_vm1, %v123_v15, 0  ;;  %vm115_vm0 = vcmp.lt.s32.totalorder %v276_v1, 0  ;;  %vm349_vm1 = vcmp.le.f32.partialorder %v113_v4, 0.7853982 }
   0xc   :  { %v23_v17 = vshrl.u32 %v22_v16, 5  ;;  %v24_v18 = vand.u32 31, %v22_v16  ;;  %v127_v21 = vand.u32 31, %v125_v19  ;;  %v290_v34 = vshrl.u32 %v125_v19, 5 }
   0xe   :  { %v25_v23 = vsub.s32 32, %v24_v18  ;;  %v27_v25 = vshll.u32 %v252_v24, %v24_v18  ;;  %v30_v27 = vshll.u32 %v253_v26, %v24_v18  ;;  %v33_v29 = vshll.u32 %v254_v28, %v24_v18 }
   0xf   :  { %v36_v31 = vshll.u32 %v255_v30, %v24_v18  ;;  %v39_v33 = vshll.u32 %v256_v32, %v24_v18  ;;  %vm42_vm2 = vcmp.lt.s32.totalorder %v23_v17, 1  ;;  %vm43_vm3 = vcmp.lt.s32.totalorder %v23_v17, 2 }
  0x10   :  { %v26_v35 = vshrl.u32 %v252_v24, %v25_v23  ;;  %v28_v36 = vshrl.u32 %v253_v26, %v25_v23  ;;  %v31_v37 = vshrl.u32 %v254_v28, %v25_v23  ;;  %v34_v38 = vshrl.u32 %v255_v30, %v25_v23 }
  0x11   :  { %v37_v39 = vshrl.u32 %v256_v32, %v25_v23  ;;  %v40_v41 = vshrl.u32 %v257_v40, %v25_v23  ;;  %vm45_vm4 = vcmp.lt.s32.totalorder %v23_v17, 4  ;;  %v128_v45 = vsub.s32 32, %v127_v21 }
  0x12   :  { %v29_v42 = vor.u32 %v28_v36, %v27_v25  ;;  %v32_v43 = vor.u32 %v31_v37, %v30_v27  ;;  %v35_v44 = vor.u32 %v34_v38, %v33_v29  ;;  %vm44_vm5 = vcmp.lt.s32.totalorder %v23_v17, 3 }
  0x13   :  { %v38_v46 = vor.u32 %v37_v39, %v36_v31  ;;  %v41_v47 = vor.u32 %v40_v41, %v39_v33  ;;  %v130_v48 = vshll.u32 %v252_v24, %v127_v21  ;;  %v133_v56 = vshll.u32 %v253_v26, %v127_v21 }
  0x14   :  { %v46_v49 = vsel %vm42_vm2, %v26_v35, %v29_v42  ;;  %v47_v50 = vsel %vm45_vm4, %v35_v44, 2102212464  ;;  %v50_v51 = vsel %vm42_vm2, %v29_v42, %v32_v43  ;;  %v54_v52 = vsel %vm42_vm2, %v32_v43, %v35_v44 }
  0x15   :  { %v48_v53 = vsel %vm44_vm5, %v32_v43, %v47_v50  ;;  %v51_v54 = vsel %vm45_vm4, %v38_v46, 920167782  ;;  %v55_v55 = vsel %vm45_vm4, %v41_v47, 1326507024  ;;  %v129_v59 = vshrl.u32 %v252_v24, %v128_v45 }
  0x16   :  { %v52_v57 = vsel %vm44_vm5, %v35_v44, %v51_v54  ;;  %v56_v58 = vsel %vm44_vm5, %v38_v46, %v55_v55  ;;  %v131_v60 = vshrl.u32 %v253_v26, %v128_v45  ;;  %v49_v61 = vsel %vm43_vm3, %v46_v49, %v48_v53 }
  0x17   :  { %v53_v62 = vsel %vm43_vm3, %v50_v51, %v52_v57  ;;  %v57_v63 = vsel %vm43_vm3, %v54_v52, %v56_v58  ;;  %v134_v3 = vshrl.u32 %v254_v28, %v128_v45  ;;  %v136_v11 = vshll.u32 %v254_v28, %v127_v21 }
  0x18   :  { %v299_v5 = vmul.u32.u64.low %v286_v20, %v57_v63  ;;  %v300_v6 = vmul.u32.u64.high %v286_v20, %v57_v63, %v299_v5  ;;  %v303_v7 = vmul.u32.u64.low %v286_v20, %v53_v62  ;;  %v304_v8 = vmul.u32.u64.high %v286_v20, %v53_v62, %v303_v7 }
  0x19   :  { %v132_v9 = vor.u32 %v131_v60, %v130_v48  ;;  %v135_v10 = vor.u32 %v134_v3, %v133_v56  ;;  %v137_v12 = vshrl.u32 %v255_v30, %v128_v45  ;;  %v139_v13 = vshll.u32 %v255_v30, %v127_v21 }
  0x1a   :  { %v140_v14 = vshrl.u32 %v256_v32, %v128_v45  ;;  %v142_v15 = vshll.u32 %v256_v32, %v127_v21  ;;  %v143_v16 = vshrl.u32 %v257_v40, %v128_v45  ;;  %v65_v17 = vmul.u32 %v286_v20, %v49_v61 }
  0x1b   :  { %v138_v18 = vor.u32 %v137_v12, %v136_v11  ;;  %vm145_vm6 = vcmp.lt.s32.totalorder %v290_v34, 1  ;;  %vm146_vm7 = vcmp.lt.s32.totalorder %v290_v34, 2  ;;  %vm67_vm8 = vc.u32 %v300_v6, %v303_v7 }
  0x1c   :  { %v68_v19 = vadd.s32 1, %v304_v8  ;;  %v141_v23 = vor.u32 %v140_v14, %v139_v13  ;;  %vm147_vm9 = vcmp.lt.s32.totalorder %v290_v34, 3  ;;  %v144_v24 = vor.u32 %v143_v16, %v142_v15 }
  0x1d   :  { %vm148_vm10 = vcmp.lt.s32.totalorder %v290_v34, 4  ;;  %v149_v25 = vsel %vm145_vm6, %v129_v59, %v132_v9  ;;  %v153_v21 = vsel %vm145_vm6, %v132_v9, %v135_v10  ;;  %v157_v28 = vsel %vm145_vm6, %v135_v10, %v138_v18 }
  0x1e   :  { %v69_v26 = vsel %vm67_vm8, %v68_v19, %v304_v8  ;;  %v150_v20 = vsel %vm148_vm10, %v138_v18, 2102212464  ;;  %v154_v27 = vsel %vm148_vm10, %v141_v23, 920167782  ;;  %v158_v32 = vsel %vm148_vm10, %v144_v24, 1326507024 }
  0x1f   :  { %v70_v29 = vadd.s32 %v69_v26, %v65_v17  ;;  %v151_v30 = vsel %vm147_vm9, %v135_v10, %v150_v20  ;;  %v155_v31 = vsel %vm147_vm9, %v138_v18, %v154_v27  ;;  %v159_v36 = vsel %vm147_vm9, %v141_v23, %v158_v32 }
  0x20   :  { %v152_v33 = vsel %vm146_vm7, %v149_v25, %v151_v30  ;;  %v156_v35 = vsel %vm146_vm7, %v153_v21, %v155_v31  ;;  %v160_v38 = vsel %vm146_vm7, %v157_v28, %v159_v36  ;;  %v66_v57 = vadd.s32 %v303_v7, %v300_v6 }
  0x21   :  { %v71_v37 = vadd.s32 536870912, %v70_v29  ;;  %v321_v39 = vmul.u32.u64.low %v288_v22, %v156_v35  ;;  %v322_v40 = vmul.u32.u64.high %v288_v22, %v156_v35, %v321_v39  ;;  %v168_v44 = vmul.u32 %v288_v22, %v152_v33 }
  0x22   :  { %v325_v41 = vmul.u32.u64.low %v288_v22, %v160_v38  ;;  %v326_v42 = vmul.u32.u64.high %v288_v22, %v160_v38, %v325_v41  ;;  %vm102_vm5 = vweird.f32 %v271_v0  ;;  %vm205_vm9 = vweird.f32 %v276_v1 }
  0x23   :  { %v72_v43 = vshrl.u32 %v71_v37, 30  ;;  %v171_v46 = vadd.s32 1, %v322_v40 }
  0x24   :  { %vm170_vm11 = vc.u32 %v326_v42, %v321_v39  ;;  %v169_v13 = vadd.s32 %v321_v39, %v326_v42 }
  0x25   :  { %v73_v45 = vshll.u32 %v72_v43, 30  ;;  %v172_v34 = vsel %vm170_vm11, %v171_v46, %v322_v40  ;;  %v96_v25 = vsub.s32 4, %v72_v43 }
  0x26   :  { %v173_v48 = vadd.s32 %v172_v34, %v168_v44 }
  0x27   :  { %v74_v47 = vsub.s32 %v70_v29, %v73_v45  ;;  %v97_v30 = vsel %vm12_vm14, %v96_v25, %v72_v43 }
  0x28   :  { %v174_v50 = vadd.s32 536870912, %v173_v48  ;;  %v99_v2 = vsel %vm337_vm15, 0, %v97_v30 }
  0x29   :  { %v76_v49 = vsub.s32 0, %v74_v47  ;;  %v103_v37 = vand.u32 3, %v99_v2 }
  0x2a   :  { %v175_v52 = vshrl.u32 %v174_v50, 30 }
  0x2b   :  { %v223_v51 = vmin.u32 %v76_v49, %v74_v47  ;;  %vm108_vm2 = vcmp.eq.s32.totalorder %v103_v37, 2  ;;  %vm105_vm3 = vcmp.eq.s32.totalorder %v103_v37, 0  ;;  %vm104_vm4 = vcmp.lt.s32.totalorder %v103_v37, 2 }
  0x2c   :  { %v176_v54 = vshll.u32 %v175_v52, 30  ;;  %v199_v36 = vsub.s32 4, %v175_v52 }
  0x2d   :  { %v78_v53 = vclz %v223_v51 }
  0x2e   :  { %v177_v56 = vsub.s32 %v173_v48, %v176_v54  ;;  %v200_v40 = vsel %vm115_vm0, %v199_v36, %v175_v52 }
  0x2f   :  { %v224_v55 = vadd.s32 4294967294, %v78_v53  ;;  %v202_v44 = vsel %vm349_vm1, 0, %v200_v40 }
  0x30   :  { %v179_v58 = vsub.s32 0, %v177_v56  ;;  %v206_v34 = vand.u32 3, %v202_v44 }
  0x31   :  { %vm225_vm12 = vcmp.lt.s32.totalorder %v224_v55, 0 }
  0x32   :  { %v81_v22 = vsel %vm225_vm12, 0, %v224_v55  ;;  %v227_v62 = vmin.u32 %v179_v58, %v177_v56  ;;  %vm211_vm6 = vcmp.eq.s32.totalorder %v206_v34, 2  ;;  %vm208_vm7 = vcmp.eq.s32.totalorder %v206_v34, 0 }
  0x33   :  { %v82_v59 = vsub.s32 32, %v81_v22  ;;  %v83_v60 = vshll.u32 %v74_v47, %v81_v22  ;;  %v86_v61 = vsub.s32 4294967266, %v81_v22  ;;  %vm207_vm8 = vcmp.lt.s32.totalorder %v206_v34, 2 }
  0x34   :  { %v181_v5 = vclz %v227_v62 }
  0x35   :  { %v84_v63 = vshrl.u32 %v66_v57, %v82_v59  ;;  %v87_v3 = vadd.s32 127, %v86_v61 }
  0x36   :  { %v228_v10 = vadd.s32 4294967294, %v181_v5 }
  0x37   :  { %v85_v8 = vor.u32 %v84_v63, %v83_v60  ;;  %v88_v9 = vshll.u32 %v87_v3, 23 }
  0x38   :  { %vm229_vm13 = vcmp.lt.s32.totalorder %v228_v10, 0 }
  0x39   :  { %v89_v11 = vor.u32 4788187, %v88_v9  ;;  %v92_v12 = vcvt.s32.f32 %v85_v8  ;;  %v184_v6 = vsel %vm229_vm13, 0, %v228_v10 }
  0x3a   :  { %v185_v7 = vsub.s32 32, %v184_v6  ;;  %v186_v15 = vshll.u32 %v177_v56, %v184_v6  ;;  %v189_v16 = vsub.s32 4294967266, %v184_v6 }
  0x3b   :  { %v90_v14 = vand.u32 2147483647, %v89_v11 }
  0x3c   :  { %v187_v18 = vshrl.u32 %v169_v13, %v185_v7  ;;  %v190_v19 = vadd.s32 127, %v189_v16 }
  0x3d   :  { %v93_v17 = vmul.f32 %v92_v12, %v90_v14 }
  0x3e   :  { %v188_v21 = vor.u32 %v187_v18, %v186_v15  ;;  %v191_v26 = vshll.u32 %v190_v19, 23 }
  0x3f   :  { %v94_v24 = vxor.u32 2147483648, %v93_v17 }
  0x40   :  { %v192_v28 = vor.u32 4788187, %v191_v26  ;;  %v195_v29 = vcvt.s32.f32 %v188_v21 }
  0x41   :  { %v95_v20 = vsel %vm12_vm14, %v94_v24, %v93_v17 }
  0x42   :  { %v98_v27 = vsel %vm337_vm15, %v271_v0, %v95_v20  ;;  %v193_v31 = vand.u32 2147483647, %v192_v28 }
  0x43   :  { %244 = vcosq.f32 %v98_v27 }
  0x44   :  { %246 = vsinq.f32 %v98_v27  ;;  %v196_v32 = vmul.f32 %v195_v29, %v193_v31 }
  0x46   :  { %v197_v35 = vxor.u32 2147483648, %v196_v32 }
  0x48   :  { %v198_v38 = vsel %vm115_vm0, %v197_v35, %v196_v32 }
  0x49   :  { %v201_v39 = vsel %vm349_vm1, %v276_v1, %v198_v38 }
  0x4a   :  { %248 = vcosq.f32 %v201_v39 }
  0x4b   :  { %250 = vsinq.f32 %v201_v39 }
  0x4d   :  { %v245_v41 = vpop.eup %244 }
  0x4e   :  { %v247_v42 = vpop.eup %246  ;;  %v109_v43 = vxor.u32 2147483648, %v245_v41 }
  0x4f   :  { %v106_v4 = vxor.u32 2147483648, %v247_v42 }
  0x50   :  { %v110_v45 = vsel %vm108_vm2, %v109_v43, %v247_v42 }
  0x51   :  { %v107_v46 = vsel %vm105_vm3, %v245_v41, %v106_v4 }
  0x52   :  { %v111_v47 = vsel %vm104_vm4, %v107_v46, %v110_v45 }
  0x53   :  { %v112_v48 = vsel %vm102_vm5, nan, %v111_v47 }
  0x54   :  { %216 = vst [vmem:[%s367_s1] sm:$0xff] %v112_v48  ;;  %v249_v49 = vpop.eup %248 }
  0x55   :  { %v251_v50 = vpop.eup %250  ;;  %v212_v51 = vxor.u32 2147483648, %v249_v49 }
  0x56   :  { %v209_v52 = vxor.u32 2147483648, %v251_v50 }
  0x57   :  { %v213_v53 = vsel %vm211_vm6, %v212_v51, %v251_v50 }
  0x58   :  { %v210_v0 = vsel %vm208_vm7, %v249_v49, %v209_v52 }
  0x59   :  { %v214_v54 = vsel %vm207_vm8, %v210_v0, %v213_v53 }
  0x5a   :  { %v215_v55 = vsel %vm205_vm9, nan, %v214_v54 }
  0x5b   :  { %217 = vst [vmem:[%s367_s1 + $0x8] sm:$0xff] %v215_v55 }

</bundles_post_ra>
